<compile_context>
chip_gen: v7x
topology: tpu7x:2x2x1
jax: 0.10.0
libtpu: 0.0.40
codegen_flags: <defaults>
</compile_context>

<pallas_src>
import functools

import numpy as np
import jax
import jax.numpy as jnp
from jax.experimental import pallas as pl
from jax.experimental.pallas import tpu as pltpu


# --------------------------------------------------------------------------- #
# Kernels
# --------------------------------------------------------------------------- #

def _cbn_kernel(x_ref, g_ref, b_ref, o_ref, *, eps, inv_count):
    """Lane-dense spatial axis: x_ref (B, tc, N) with N % 128 == 0.

    gamma/beta refs are (B, tc, 1) and broadcast over the lane axis.
    """
    x = x_ref[...].astype(jnp.float32)                        # (B, tc, N)

    # Per-channel batch statistics over (batch, spatial) in one pass:
    # var = E[x^2] - mean^2 (no materialized x-mean temporary).
    s1 = jnp.sum(jnp.sum(x, axis=2, keepdims=True), axis=0, keepdims=True)
    s2 = jnp.sum(jnp.sum(x * x, axis=2, keepdims=True), axis=0, keepdims=True)
    mean = s1 * inv_count                                     # (1, tc, 1)
    var = s2 * inv_count - mean * mean                        # biased variance

    inv = jax.lax.rsqrt(var + eps)                            # EUP slot

    # Fused normalize + conditional affine: out = x * scale + shift.
    scale = g_ref[...].astype(jnp.float32) * inv              # (B, tc, 1)
    shift = b_ref[...].astype(jnp.float32) - scale * mean     # (B, tc, 1)
    o_ref[...] = (x * scale + shift).astype(o_ref.dtype)


def _cbn_grouped_kernel(x_ref, g_ref, b_ref, o_ref, *, eps, inv_count,
                        n_spatial, n_groups):
    """Small feature maps folded to a lane-dense row.

    x_ref: (B, tcg, L) with L = n_groups * n_spatial (a multiple of 128); each
    row holds n_groups consecutive original channels.  g_ref/b_ref: (B, tcg,
    n_groups).  Statistics are per original channel, i.e. per static lane
    segment of length n_spatial.
    """
    x = x_ref[...].astype(jnp.float32)                        # (B, tcg, L)
    gam = g_ref[...].astype(jnp.float32)                      # (B, tcg, ng)
    bet = b_ref[...].astype(jnp.float32)
    N = n_spatial

    for j in range(n_groups):                                 # static unroll (small)
        lo, hi = j * N, (j + 1) * N
        xs = x[:, :, lo:hi]                                   # (B, tcg, N)
        s1 = jnp.sum(jnp.sum(xs, axis=2, keepdims=True), axis=0, keepdims=True)
        s2 = jnp.sum(jnp.sum(xs * xs, axis=2, keepdims=True), axis=0,
                     keepdims=True)
        mean = s1 * inv_count                                 # (1, tcg, 1)
        var = s2 * inv_count - mean * mean
        inv = jax.lax.rsqrt(var + eps)
        scale = gam[:, :, j:j + 1] * inv                      # (B, tcg, 1)
        shift = bet[:, :, j:j + 1] - scale * mean
        o_ref[:, :, lo:hi] = (xs * scale + shift).astype(o_ref.dtype)


# --------------------------------------------------------------------------- #
# Sizing helpers
# --------------------------------------------------------------------------- #

def _default_vmem_limit_bytes():
    """Scoped-VMEM limit derived from the actual chip when possible."""
    try:
        info = pltpu.get_tpu_info()
        cap = getattr(info, "vmem_capacity_bytes", None)
        if cap:
            # Half of physical VMEM, never above 64 MiB, never below 16 MiB.
            return int(max(16 << 20, min(cap // 2, 64 << 20)))
    except Exception:
        pass
    return 32 << 20


def _pick_channel_tile(B, C, N, itemsize, budget_bytes, min_blocks=4):
    """Largest channel tile such that:
      * it is C, or a dtype-aware multiple (8/f32, 16/bf16, 32/int8) dividing C,
      * one (B, tc, N) block fits the per-block budget (budget already accounts
        for the ~4x double-buffered in+out pipeline footprint),
      * the grid keeps >= min_blocks (ideally) / >= 2 (at least) blocks so the
        pipeline overlaps and both v7x TensorCores get work.
    """
    step = max(8, 32 // max(1, itemsize))
    cands = [c for c in range(step, C + 1, step) if C % c == 0]
    if not cands:
        return C                                  # tiny C: full-dim block is legal

    fitting = [c for c in cands if B * c * N * itemsize <= budget_bytes]
    if not fitting:
        # TODO(synk): even the minimum tile exceeds the budget -> needs the
        # N-streamed two-pass variant; fall back to the smallest tile.
        fitting = [min(cands)]

    for nb in (min_blocks, 2):
        pref = [c for c in fitting if C // c >= nb]
        if pref:
            return max(pref)
    return max(fitting)


# --------------------------------------------------------------------------- #
# Wrapper
# --------------------------------------------------------------------------- #

def conditional_batchnorm2d_pallas(x, y, embed_w, *, eps=1e-5):
    B, C, H, W = x.shape
    N = H * W
    itemsize = jnp.dtype(x.dtype).itemsize

    # Embedding lookup: tiny (B rows) gather, done host-side.
    emb = jnp.take(embed_w, y, axis=0)                        # (B, 2C)
    gamma = emb[:, :C]
    beta = emb[:, C:]

    vmem_limit = _default_vmem_limit_bytes()
    # Pipeline holds ~2x input block + 2x output block (+ tiny gamma/beta).
    block_budget = vmem_limit // 5

    inv_count = 1.0 / float(B * N)
    compiler_params = pltpu.CompilerParams(
        dimension_semantics=("parallel",),        # channel blocks independent
        vmem_limit_bytes=vmem_limit,
    )
    cost = pl.CostEstimate(
        flops=int(8 * B * C * N),
        transcendentals=int(C),
        bytes_accessed=int(2 * B * C * N * itemsize + 8 * B * C),
    )

    use_grouped = (N % 128 != 0) and (128 % N == 0) and (C % (128 // N) == 0)

    if use_grouped:
        # Fold g consecutive channels into one 128-lane row (free reshape) so
        # the HBM read/write blocks are lane-dense (no masked partial stores).
        ng = 128 // N
        Cg = C // ng
        L = ng * N                                            # == 128
        x_flat = x.reshape(B, Cg, L)
        gam = gamma.reshape(B, Cg, ng).astype(jnp.float32)
        bet = beta.reshape(B, Cg, ng).astype(jnp.float32)

        tcg = _pick_channel_tile(B, Cg, L, itemsize, block_budget)
        grid = (Cg // tcg,)

        kernel = functools.partial(_cbn_grouped_kernel, eps=float(eps),
                                   inv_count=inv_count, n_spatial=N,
                                   n_groups=ng)
        out_flat = pl.pallas_call(
            kernel,
            out_shape=jax.ShapeDtypeStruct((B, Cg, L), x.dtype),
            grid_spec=pltpu.PrefetchScalarGridSpec(
                num_scalar_prefetch=0,
                grid=grid,
                in_specs=[
                    pl.BlockSpec((B, tcg, L), lambda c: (0, c, 0)),
                    pl.BlockSpec((B, tcg, ng), lambda c: (0, c, 0)),
                    pl.BlockSpec((B, tcg, ng), lambda c: (0, c, 0)),
                ],
                out_specs=pl.BlockSpec((B, tcg, L), lambda c: (0, c, 0)),
            ),
            compiler_params=compiler_params,
            cost_estimate=cost,
        )(x_flat, gam, bet)
        return out_flat.reshape(B, C, H, W)

    # Default path: spatial axis is already lane-dense (or cannot be folded).
    # TODO(synk): when N is neither a multiple of 128 nor a divisor of 128 the
    # last axis is not lane-dense and stores are masked; SAGAN shapes never hit
    # this case.
    x_flat = x.reshape(B, C, N)
    gam = gamma.reshape(B, C, 1).astype(jnp.float32)
    bet = beta.reshape(B, C, 1).astype(jnp.float32)

    tc = _pick_channel_tile(B, C, N, itemsize, block_budget)
    grid = (C // tc,)

    kernel = functools.partial(_cbn_kernel, eps=float(eps), inv_count=inv_count)
    out_flat = pl.pallas_call(
        kernel,
        out_shape=jax.ShapeDtypeStruct((B, C, N), x.dtype),
        grid_spec=pltpu.PrefetchScalarGridSpec(
            num_scalar_prefetch=0,
            grid=grid,
            in_specs=[
                pl.BlockSpec((B, tc, N), lambda c: (0, c, 0)),   # x channel block
                pl.BlockSpec((B, tc, 1), lambda c: (0, c, 0)),   # gamma
                pl.BlockSpec((B, tc, 1), lambda c: (0, c, 0)),   # beta
            ],
            out_specs=pl.BlockSpec((B, tc, N), lambda c: (0, c, 0)),
        ),
        compiler_params=compiler_params,
        cost_estimate=cost,
    )(x_flat, gam, bet)
    return out_flat.reshape(B, C, H, W)


# --------------------------------------------------------------------------- #
# Pure-JAX reference (matches the PyTorch train-mode forward)
# --------------------------------------------------------------------------- #

def conditional_batchnorm2d_reference(x, y, embed_w, eps=1e-5):
    B, C, H, W = x.shape
    mean = jnp.mean(x, axis=(0, 2, 3), keepdims=True)
    var = jnp.mean((x - mean) ** 2, axis=(0, 2, 3), keepdims=True)  # biased
    xhat = (x - mean) / jnp.sqrt(var + eps)
    emb = embed_w[y]                                          # (B, 2C)
    gamma = emb[:, :C].reshape(B, C, 1, 1)
    beta = emb[:, C:].reshape(B, C, 1, 1)
    return gamma * xhat + beta


if __name__ == "__main__":
    key = jax.random.PRNGKey(0)
    kx1, kx2, ky, kw1, kw2 = jax.random.split(key, 5)

    B, C = 2, 16
    num_classes = 10

    # Random "trained" embedding so the conditional scale/shift path is
    # actually exercised (module init would be the identity affine).
    embed_w = jnp.concatenate(
        [1.0 + 0.2 * jax.random.normal(kw1, (num_classes, C), jnp.float32),
         0.1 * jax.random.normal(kw2, (num_classes, C), jnp.float32)],
        axis=1)                                               # (num_classes, 2C)
    y = jax.random.randint(ky, (B,), 0, num_classes)

    fwd = jax.jit(conditional_batchnorm2d_pallas)

    # Case 1: H*W multiple of 128 -> default lane-dense channel-tiled path.
    x1 = jax.random.normal(kx1, (B, C, 16, 16), jnp.float32)
    out1 = jax.block_until_ready(fwd(x1, y, embed_w))
    ref1 = jax.block_until_ready(conditional_batchnorm2d_reference(x1, y, embed_w))
    np.testing.assert_allclose(np.asarray(out1), np.asarray(ref1),
                               rtol=1e-4, atol=1e-4)

    # Case 2: small feature map (H*W = 64 < 128) -> grouped lane-dense path.
    x2 = jax.random.normal(kx2, (B, C, 8, 8), jnp.float32)
    out2 = jax.block_until_ready(fwd(x2, y, embed_w))
    ref2 = jax.block_until_ready(conditional_batchnorm2d_reference(x2, y, embed_w))
    np.testing.assert_allclose(np.asarray(out2), np.asarray(ref2),
                               rtol=1e-4, atol=1e-4)

    print("KERNEL_OK")
</pallas_src>

<mosaic_0001>
module attributes {stable_mosaic.version = 11 : i64} {
  func.func @_cbn_kernel(%arg0: i32, %arg1: memref<2x8x256xf32, #tpu.memory_space<vmem>>, %arg2: memref<2x8x1xf32, #tpu.memory_space<vmem>>, %arg3: memref<2x8x1xf32, #tpu.memory_space<vmem>>, %arg4: memref<2x8x256xf32, #tpu.memory_space<vmem>>) attributes {dimension_semantics = [#tpu.dimension_semantics<parallel>], iteration_bounds = array<i64: 2>, scalar_prefetch = 0 : i64, scratch_operands = 0 : i64, tpu.core_type = #tpu.core_type<tc>, window_params = [{transform_indices = @transform_0, window_bounds = array<i64: 2, 8, 256>}, {transform_indices = @transform_1, window_bounds = array<i64: 2, 8, 1>}, {transform_indices = @transform_2, window_bounds = array<i64: 2, 8, 1>}, {transform_indices = @transform_3, window_bounds = array<i64: 2, 8, 256>}]} {
    %c0 = arith.constant 0 : index
    %c0_0 = arith.constant 0 : index
    %c0_1 = arith.constant 0 : index
    %0 = vector.load %arg1[%c0, %c0_0, %c0_1] : memref<2x8x256xf32, #tpu.memory_space<vmem>>, vector<2x8x256xf32>
    %cst = arith.constant dense<0.000000e+00> : vector<2x8xf32>
    %1 = vector.multi_reduction <add>, %0, %cst [2] : vector<2x8x256xf32> to vector<2x8xf32>
    %2 = vector.shape_cast %1 : vector<2x8xf32> to vector<2x8x1xf32>
    %cst_2 = arith.constant dense<0.000000e+00> : vector<8x1xf32>
    %3 = vector.multi_reduction <add>, %2, %cst_2 [0] : vector<2x8x1xf32> to vector<8x1xf32>
    %4 = vector.shape_cast %3 : vector<8x1xf32> to vector<1x8x1xf32>
    %5 = arith.mulf %0, %0 : vector<2x8x256xf32>
    %cst_3 = arith.constant dense<0.000000e+00> : vector<2x8xf32>
    %6 = vector.multi_reduction <add>, %5, %cst_3 [2] : vector<2x8x256xf32> to vector<2x8xf32>
    %7 = vector.shape_cast %6 : vector<2x8xf32> to vector<2x8x1xf32>
    %cst_4 = arith.constant dense<0.000000e+00> : vector<8x1xf32>
    %8 = vector.multi_reduction <add>, %7, %cst_4 [0] : vector<2x8x1xf32> to vector<8x1xf32>
    %9 = vector.shape_cast %8 : vector<8x1xf32> to vector<1x8x1xf32>
    %cst_5 = arith.constant 0.001953125 : f32
    %10 = vector.broadcast %cst_5 : f32 to vector<1x8x1xf32>
    %11 = arith.mulf %4, %10 : vector<1x8x1xf32>
    %cst_6 = arith.constant 0.001953125 : f32
    %12 = vector.broadcast %cst_6 : f32 to vector<1x8x1xf32>
    %13 = arith.mulf %9, %12 : vector<1x8x1xf32>
    %14 = arith.mulf %11, %11 : vector<1x8x1xf32>
    %15 = arith.subf %13, %14 : vector<1x8x1xf32>
    %cst_7 = arith.constant 9.99999974E-6 : f32
    %16 = vector.broadcast %cst_7 : f32 to vector<1x8x1xf32>
    %17 = arith.addf %15, %16 : vector<1x8x1xf32>
    %18 = math.rsqrt %17 : vector<1x8x1xf32>
    %c0_8 = arith.constant 0 : index
    %c0_9 = arith.constant 0 : index
    %c0_10 = arith.constant 0 : index
    %19 = vector.load %arg2[%c0_8, %c0_9, %c0_10] : memref<2x8x1xf32, #tpu.memory_space<vmem>>, vector<2x8x1xf32>
    %20 = vector.broadcast %18 : vector<1x8x1xf32> to vector<2x8x1xf32>
    %21 = arith.mulf %19, %20 : vector<2x8x1xf32>
    %c0_11 = arith.constant 0 : index
    %c0_12 = arith.constant 0 : index
    %c0_13 = arith.constant 0 : index
    %22 = vector.load %arg3[%c0_11, %c0_12, %c0_13] : memref<2x8x1xf32, #tpu.memory_space<vmem>>, vector<2x8x1xf32>
    %23 = vector.broadcast %11 : vector<1x8x1xf32> to vector<2x8x1xf32>
    %24 = arith.mulf %21, %23 : vector<2x8x1xf32>
    %25 = arith.subf %22, %24 : vector<2x8x1xf32>
    %26 = vector.broadcast %21 : vector<2x8x1xf32> to vector<2x8x256xf32>
    %27 = arith.mulf %0, %26 : vector<2x8x256xf32>
    %28 = vector.broadcast %25 : vector<2x8x1xf32> to vector<2x8x256xf32>
    %29 = arith.addf %27, %28 : vector<2x8x256xf32>
    %c0_14 = arith.constant 0 : index
    %c0_15 = arith.constant 0 : index
    %c0_16 = arith.constant 0 : index
    %30 = vector.load %arg4[%c0_14, %c0_15, %c0_16] : memref<2x8x256xf32, #tpu.memory_space<vmem>>, vector<2x8x256xf32>
    tpu.vector_store %arg4[%c0_14, %c0_15, %c0_16], %29 {strides = array<i32>} : memref<2x8x256xf32, #tpu.memory_space<vmem>>, vector<2x8x256xf32>,
    return
  }
  func.func @transform_0(%arg0: i32) -> (i32, i32, i32) {
    %c0_i32 = arith.constant 0 : i32
    %c0_i32_0 = arith.constant 0 : i32
    %c0_i32_1 = arith.constant 0 : i32
    return %c0_i32, %arg0, %c0_i32_0 : i32, i32, i32
  }
  func.func @transform_1(%arg0: i32) -> (i32, i32, i32) {
    %c0_i32 = arith.constant 0 : i32
    %c0_i32_0 = arith.constant 0 : i32
    %c0_i32_1 = arith.constant 0 : i32
    return %c0_i32, %arg0, %c0_i32_0 : i32, i32, i32
  }
  func.func @transform_2(%arg0: i32) -> (i32, i32, i32) {
    %c0_i32 = arith.constant 0 : i32
    %c0_i32_0 = arith.constant 0 : i32
    %c0_i32_1 = arith.constant 0 : i32
    return %c0_i32, %arg0, %c0_i32_0 : i32, i32, i32
  }
  func.func @transform_3(%arg0: i32) -> (i32, i32, i32) {
    %c0_i32 = arith.constant 0 : i32
    %c0_i32_0 = arith.constant 0 : i32
    %c0_i32_1 = arith.constant 0 : i32
    return %c0_i32, %arg0, %c0_i32_0 : i32, i32, i32
  }
}

</mosaic_0001>

<bundles_post_ra>
// kernel: conditional_batchnorm2d_pallas.1
= control target key start
LH: loop header
LB: loop body
LE: loop exit
PB: predicated region body
PF: predicated region fallthrough
CT: control target
= control target key end

     0   :  { %s599_s12 = smov 0   ;;  %s601_s13 = smov 0   ;;  %s687_s0 = inlined_call_operand.vmem [shape: f32[2,16,256], index: 0, kind: input, shape index: {}]   ;;  %s688_s1 = inlined_call_operand.vmem [shape: f32[2,16,1], index: 1, kind: input, shape index: {}]   ;;  %s689_s2 = inlined_call_operand.vmem [shape: f32[2,16,1], index: 2, kind: input, shape index: {}]   ;;  %s690_s3 = inlined_call_operand.vmem [shape: f32[2,16,256], index: 3, kind: output, shape index: {}]  }
   0x1   :  { %s603_s14 = smov 0  }
   0x2 LB: > { %s502_s15 = sadd.s32 4294967295, %s576_s14   ;;  %s616_s16 = sadd.s32 1, %s576_s14   ;;  %s576_s14 = sphi %s603_s14, %s695_s14   ;;  %s572_s13 = sphi %s601_s13, %s694_s13   ;;  %s568_s12 = sphi %s599_s12, %s693_s12  }
   0x3   : > { %s17_s17 = ssub.s32 %s576_s14, %s616_s16  ;;  %s20_s18 = sadd.s32 1, %s572_s13 }
   0x4   : > { %p18_p0 = scmp.eq.s32.totalorder %s17_s17, 0  ;;  %p27_p1 = scmp.ne.s32.totalorder %s572_s13, %s568_s12 }
   0x5   : > { %p28_p2 = scmp.eq.s32.totalorder %s576_s14, 0  ;;  %p109_p3 = scmp.eq.s32.totalorder %s502_s15, 1 }
   0x6   : > { %s627_s19 = scalar_select %p18_p0, %s572_s13, %s20_s18  }
   0x7   : > { %p629_p4 = por %p28_p2, %p27_p1  ;;  %p633_p5 = por %p109_p3, %p27_p1 }
   0x8   : > { %p505_p6 = scmp.ge.s32.totalorder %s576_s14, 2 }
   0xa   : > { %131 = sbr.rel (%p505_p6) target bundleno = 38 (0x26), region = 16 }
  0x11   : > { %134 = sbr.rel (!%p629_p4) target bundleno = 24 (0x18), region = 20  ;;  %s136_s22 = sand.u32 (%p629_p4), 1, %s572_s13  }
  0x12   : > { %s523_s23 = sshll.u32 (%p629_p4), %s576_s14, 4  ;;  %s506_s24 = sshll.u32 (%p629_p4), %s136_s22, 5 }
  0x13   : > { %s141_s27 = scalar_lea.vmem (%p629_p4), %s687_s0, %s523_s23  ;;  %s138_s28 = scalar_lea.vmem (%p629_p4), [#allocation2], %s506_s24 }
  0x14   : > { %v154_v0 = vld [vmem:[%s141_s27] sm:$0xff] (%p629_p4)  ;;  %v156_v1 = vld [vmem:[%s141_s27 + $0x8] sm:$0xff] (%p629_p4) }
  0x15   : > { %v158_v2 = vld [vmem:[%s141_s27 + $0x20] sm:$0xff] (%p629_p4)  ;;  %155 = vst [vmem:[%s138_s28] sm:$0xff] (%p629_p4), %v154_v0  ;;  %157 = vst [vmem:[%s138_s28 + $0x8] sm:$0xff] (%p629_p4), %v156_v1  ;;  %v160_v3 = vld [vmem:[%s141_s27 + $0x28] sm:$0xff] (%p629_p4) }
  0x16   : > { %159 = vst [vmem:[%s138_s28 + $0x10] sm:$0xff] (%p629_p4), %v158_v2  ;;  %161 = vst [vmem:[%s138_s28 + $0x18] sm:$0xff] (%p629_p4), %v160_v3 }
  0x18 PF: > { %167 = sbr.rel (!%p629_p4) target bundleno = 31 (0x1f), region = 43  ;;  %s169_s29 = sand.u32 (%p629_p4), 1, %s572_s13  }
  0x19   : > { %s510_s30 = sshll.u32 (%p629_p4), %s576_s14, 3  ;;  %s509_s4 = sshll.u32 (%p629_p4), %s169_s29, 4 }
  0x1a   : > { %s173_s7 = scalar_lea.vmem (%p629_p4), %s688_s1, %s510_s30  ;;  %s171_s8 = scalar_lea.vmem (%p629_p4), [#allocation3], %s509_s4 }
  0x1b   : > { %v203_v4 = vld [vmem:[%s173_s7] sm:$0xff] (%p629_p4)  ;;  %v205_v5 = vld [vmem:[%s173_s7 + $0x10] sm:$0xff] (%p629_p4) }
  0x1c   : > { %204 = vst [vmem:[%s171_s8] sm:$0xff] (%p629_p4), %v203_v4  ;;  %206 = vst [vmem:[%s171_s8 + $0x8] sm:$0xff] (%p629_p4), %v205_v5 }
  0x1f PF: > { %212 = sbr.rel (!%p629_p4) target bundleno = 38 (0x26), region = 81  ;;  %s214_s9 = sand.u32 (%p629_p4), 1, %s572_s13  }
  0x20   : > { %s512_s10 = sshll.u32 (%p629_p4), %s576_s14, 3  ;;  %s511_s11 = sshll.u32 (%p629_p4), %s214_s9, 4 }
  0x21   : > { %s218_s22 = scalar_lea.vmem (%p629_p4), %s689_s2, %s512_s10  ;;  %s216_s23 = scalar_lea.vmem (%p629_p4), [#allocation4], %s511_s11 }
  0x22   : > { %v248_v6 = vld [vmem:[%s218_s22] sm:$0xff] (%p629_p4)  ;;  %v250_v7 = vld [vmem:[%s218_s22 + $0x10] sm:$0xff] (%p629_p4) }
  0x23   : > { %249 = vst [vmem:[%s216_s23] sm:$0xff] (%p629_p4), %v248_v6  ;;  %251 = vst [vmem:[%s216_s23 + $0x8] sm:$0xff] (%p629_p4), %v250_v7 }
  0x26 PF: > { %p513_p7 = scmp.ge.s32.totalorder %s576_s14, 1  ;;  %p256_p8 = scmp.lt.s32.totalorder %s576_s14, 3 }
  0x28   : > { %p257_p9 = pnand %p513_p7, %p256_p8 }
  0x29   : > { %s263_s20 = sand.u32 (!%p257_p9), 1, %s568_s12   ;;  %v578_v20 = vmov (!%p257_p9), 0  }
  0x2a   : > { %260 = sbr.rel (%p257_p9) target bundleno = 363 (0x16b), region = 119  ;;  %s664_s24 = sshll.u32 (!%p257_p9), %s263_s20, 5  ;;  %551 = vset.pattern.permute.xlu1 (!%p257_p9), %v578_v20  ;;  %550 = vset.pattern.permute.xlu0 (!%p257_p9), %v578_v20 }
  0x2b   : > { %s265_s25 = scalar_lea.vmem (!%p257_p9), [#allocation2], %s664_s24  ;;  %s515_s26 = sshll.u32 (!%p257_p9), %s263_s20, 4 }
  0x2c   : > { %v307_v8 = vld [vmem:[%s265_s25] sm:$0xff] (!%p257_p9)  ;;  %v308_v9 = vld [vmem:[%s265_s25 + $0x8] sm:$0xff] (!%p257_p9)  ;;  %v309_v10 = vld [vmem:[%s265_s25 + $0x10] sm:$0xff] (!%p257_p9)  ;;  %s272_s27 = scalar_lea.vmem (!%p257_p9), [#allocation3], %s515_s26  ;;  %s279_s28 = scalar_lea.vmem (!%p257_p9), [#allocation4], %s515_s26 }
  0x2d   : > { %v311_v11 = vadd.f32 (!%p257_p9), %v308_v9, %v307_v8  ;;  %v318_v12 = vmul.f32 (!%p257_p9), %v307_v8, %v307_v8  ;;  %v319_v13 = vmul.f32 (!%p257_p9), %v308_v9, %v308_v9  ;;  %v310_v14 = vld [vmem:[%s265_s25 + $0x18] sm:$0xff] (!%p257_p9)  ;;  %v320_v15 = vmul.f32 (!%p257_p9), %v309_v10, %v309_v10  ;;  %v335_v33 = vld [vmem:[%s272_s27] sm:$0xff] (!%p257_p9)  ;;  %s306_s12 = scalar_lea.vmem (!%p257_p9), [#allocation5], %s664_s24 }
  0x2e   : > { %v321_v16 = vmul.f32 (!%p257_p9), %v310_v14, %v310_v14  ;;  %v314_v18 = vadd.f32 (!%p257_p9), %v310_v14, %v309_v10  ;;  %v336_v32 = vld [vmem:[%s272_s27 + $0x8] sm:$0xff] (!%p257_p9)  ;;  %v339_v37 = vld [vmem:[%s279_s28] sm:$0xff] (!%p257_p9) }
  0x2f   : > { %312 = vadd.xlane.f32.xlu0 (!%p257_p9), %v311_v11  ;;  %v322_v17 = vadd.f32 (!%p257_p9), %v319_v13, %v318_v12  ;;  %v340_v41 = vld [vmem:[%s279_s28 + $0x8] sm:$0xff] (!%p257_p9) }
  0x30   : > { %v325_v19 = vadd.f32 (!%p257_p9), %v321_v16, %v320_v15 }
  0x31   : > { %323 = vadd.xlane.f32.xlu1 %v322_v17  ;;  %s524_s29 = sshll.u32 (%p633_p5), %s502_s15, 4 }
  0x32   : > { %s386_s5 = scalar_lea.vmem (%p633_p5), %s690_s3, %s524_s29 }
  0x33   : > { %315 = vadd.xlane.f32.xlu0 %v314_v18 }
  0x35   : > { %326 = vadd.xlane.f32.xlu1 %v325_v19 }
  0xbc   : > { %v313_v21 = vpop.xlane.xlu0 %312 }
  0xbe   : > { %v324_v22 = vpop.xlane.xlu1 %323 }
  0xc0   : > { %v316_v23 = vpop.xlane.xlu0 %315 }
  0xc1   : > { %v317_v24 = vadd.f32 %v316_v23, %v313_v21 }
  0xc2   : > { %v327_v25 = vpop.xlane.xlu1 %326 }
  0xc3   : > { %v329_v26 = vmul.f32 0.001953125, %v317_v24  ;;  %v328_v27 = vadd.f32 %v327_v25, %v324_v22 }
  0xc5   : > { %v330_v28 = vmul.f32 0.001953125, %v328_v27  ;;  %v331_v29 = vmul.f32 %v329_v26, %v329_v26 }
  0xc7   : > { %v332_v30 = vsub.f32 %v330_v28, %v331_v29 }
  0xc9   : > { %v333_v31 = vadd.f32 1e-05, %v332_v30 }
  0xcb   : > { %552 = vrsqrt.f32 %v333_v31 }
  0xd5   : > { %v553_v34 = vpop.eup %552 }
  0xd6   : > { %v338_v35 = vmul.f32 %v553_v34, %v336_v32  ;;  %v337_v36 = vmul.f32 %v553_v34, %v335_v33 }
  0xd8   : > { %352 = vperm.xlu1 %551, %v338_v35   ;;  %347 = vperm.xlu0 %550, %v337_v36   ;;  %v341_v38 = vmul.f32 %v337_v36, %v329_v26  ;;  %v342_v40 = vmul.f32 %v338_v35, %v329_v26 }
  0xda   : > { %v343_v39 = vsub.f32 %v339_v37, %v341_v38  ;;  %v344_v42 = vsub.f32 %v340_v41, %v342_v40 }
  0xdc   : > { %361 = vperm.xlu1 %551, %v343_v39  }
  0xe0   : > { %366 = vperm.xlu1 %551, %v344_v42  }
 0x157   : > { %v353_v43 = vpop.permute.xlu1 %352  ;;  %v348_v44 = vpop.permute.xlu0 %347 }
 0x158   : > { %v355_v45 = vmul.f32 %v348_v44, %v307_v8  ;;  %v356_v46 = vmul.f32 %v348_v44, %v308_v9  ;;  %v357_v50 = vmul.f32 %v353_v43, %v309_v10  ;;  %v358_v51 = vmul.f32 %v353_v43, %v310_v14 }
 0x15b   : > { %v362_v47 = vpop.permute.xlu1 %361 }
 0x15c   : > { %v369_v48 = vadd.f32 %v362_v47, %v355_v45  ;;  %v370_v49 = vadd.f32 %v362_v47, %v356_v46  ;;  %383 = sbr.rel (!%p633_p5) target bundleno = 363 (0x16b), region = 135 }
 0x15e   : > { %373 = vst [vmem:[%s306_s12] sm:$0xff] %v369_v48  ;;  %374 = vst [vmem:[%s306_s12 + $0x8] sm:$0xff] %v370_v49 }
 0x15f   : > { %v367_v52 = vpop.permute.xlu1 %366 }
 0x160   : > { %v371_v53 = vadd.f32 %v367_v52, %v357_v50  ;;  %v372_v54 = vadd.f32 %v367_v52, %v358_v51 }
 0x162   : > { %375 = vst [vmem:[%s306_s12 + $0x10] sm:$0xff] %v371_v53  ;;  %376 = vst [vmem:[%s306_s12 + $0x18] sm:$0xff] %v372_v54 }
 0x165   : > { %v399_v55 = vld [vmem:[%s306_s12] sm:$0xff]  ;;  %v401_v56 = vld [vmem:[%s306_s12 + $0x8] sm:$0xff] }
 0x166   : > { %400 = vst [vmem:[%s386_s5] sm:$0xff] %v399_v55  ;;  %402 = vst [vmem:[%s386_s5 + $0x8] sm:$0xff] %v401_v56 }
 0x169   : > { %v403_v57 = vld [vmem:[%s306_s12 + $0x10] sm:$0xff]  ;;  %v405_v58 = vld [vmem:[%s306_s12 + $0x18] sm:$0xff] }
 0x16a   : > { %404 = vst [vmem:[%s386_s5 + $0x20] sm:$0xff] %v403_v57  ;;  %406 = vst [vmem:[%s386_s5 + $0x28] sm:$0xff] %v405_v58 }
 0x16b PF: > { %p10_p10 = scmp.ge.s32.totalorder %s616_s16, 4   ;;  %s693_s12 = smov %s572_s13 }
 0x16c   : > { %s694_s13 = smov %s627_s19  ;;  %s695_s14 = smov %s616_s16 }
 0x16d   :  { %12 = sbr.rel (!%p10_p10) target bundleno = 2 (0x2), region = 205 }

</bundles_post_ra>
